<compile_context>
chip_gen: v7x
topology: tpu7x:2x2x1
jax: 0.10.0
libtpu: 0.0.40
codegen_flags: <defaults>
</compile_context>

<pallas_src>
import jax
import jax.numpy as jnp
from jax.experimental import pallas as pl
from jax.experimental.pallas import tpu as pltpu


def _round_up(n: int, m: int) -> int:
    return ((n + m - 1) // m) * m


def dqn_kernel(x_ref, w1_ref, b1_ref, w2_ref, b2_ref, w3_ref, b3_ref, o_ref):
    # Cast activations to bf16 for the MXU; accumulate in f32.
    # Bias add + ReLU stay in f32 on the VPU.
    x = x_ref[...].astype(jnp.bfloat16)

    h1 = jnp.dot(x, w1_ref[...], preferred_element_type=jnp.float32)
    h1 = jnp.maximum(h1 + b1_ref[...], 0.0)

    h2 = jnp.dot(h1.astype(jnp.bfloat16), w2_ref[...],
                 preferred_element_type=jnp.float32)
    h2 = jnp.maximum(h2 + b2_ref[...], 0.0)

    o = jnp.dot(h2.astype(jnp.bfloat16), w3_ref[...],
                preferred_element_type=jnp.float32)
    o_ref[...] = (o + b3_ref[...]).astype(o_ref.dtype)


def dqn_forward(x, params, *, block_b=2048):
    """DQN MLP forward in one Pallas kernel, tiled over the batch axis only.

    x: [B, n_observations], any float dtype (cast in-kernel, matching the
       PyTorch module's dtype coercion).
    params: pre-transposed bf16 weights w1,w2,w3 ([in, out]) and 2-D f32 biases.
    Returns: [B, n_actions] float32 Q-values.
    """
    w1, b1 = params["w1"], params["b1"]
    w2, b2 = params["w2"], params["b2"]
    w3, b3 = params["w3"], params["b3"]

    B, n_obs = x.shape
    n_actions = w3.shape[1]

    # ---- adaptive batch tile (multiple of 8 sublanes) ----
    block_b = max(8, _round_up(int(block_b), 8))
    if B <= 256:
        # Single right-sized tile for acting-style batches.
        tb = min(block_b, _round_up(B, 8))
    else:
        # >= 2 balanced grid steps so the "parallel" axis can shard across
        # v7x's two TensorCores (no-op on v5e/v6e), capped at block_b.
        tb = min(block_b, _round_up(pl.cdiv(B, 2), 8))
    num_tiles = pl.cdiv(B, tb)  # Pallas masks the ragged last block.

    # Weights/biases: full-extent blocks, constant index_map -> resident in
    # VMEM across grid steps (no per-step re-DMA). Total ~70 KB of bf16/f32.
    def resident(a):
        return pl.BlockSpec(a.shape, lambda i, _nd=a.ndim: (0,) * _nd)

    return pl.pallas_call(
        dqn_kernel,
        out_shape=jax.ShapeDtypeStruct((B, n_actions), jnp.float32),
        grid=(num_tiles,),
        in_specs=[
            pl.BlockSpec((tb, n_obs), lambda i: (i, 0)),   # x: streamed per tile
            resident(w1), resident(b1),
            resident(w2), resident(b2),
            resident(w3), resident(b3),
        ],
        out_specs=pl.BlockSpec((tb, n_actions), lambda i: (i, 0)),
        compiler_params=pltpu.CompilerParams(
            dimension_semantics=("parallel",),
        ),
    )(x, w1, b1, w2, b2, w3, b3)


def init_dqn_params(key, n_observations, n_actions, hidden=128):
    """Deterministic init matching nn.Linear's default:
    U(-1/sqrt(fan_in), 1/sqrt(fan_in)) for weight and bias.
    Weights stored [fan_in, fan_out] in bf16 (MXU operands); biases f32."""
    keys = jax.random.split(key, 6)

    def linear(kw, kb, fan_in, fan_out):
        bound = 1.0 / jnp.sqrt(jnp.float32(fan_in))
        w = jax.random.uniform(kw, (fan_in, fan_out), jnp.float32, -bound, bound)
        b = jax.random.uniform(kb, (1, fan_out), jnp.float32, -bound, bound)
        return w.astype(jnp.bfloat16), b

    w1, b1 = linear(keys[0], keys[1], n_observations, hidden)
    w2, b2 = linear(keys[2], keys[3], hidden, hidden)
    w3, b3 = linear(keys[4], keys[5], hidden, n_actions)
    return {"w1": w1, "b1": b1, "w2": w2, "b2": b2, "w3": w3, "b3": b3}


def dqn_reference(x, params):
    """Pure-JAX reference with the same bf16-operand / f32-accumulate math."""
    h = jnp.dot(x.astype(jnp.bfloat16), params["w1"],
                preferred_element_type=jnp.float32)
    h = jnp.maximum(h + params["b1"], 0.0)
    h = jnp.dot(h.astype(jnp.bfloat16), params["w2"],
                preferred_element_type=jnp.float32)
    h = jnp.maximum(h + params["b2"], 0.0)
    o = jnp.dot(h.astype(jnp.bfloat16), params["w3"],
                preferred_element_type=jnp.float32)
    return o + params["b3"]


if __name__ == "__main__":
    key = jax.random.PRNGKey(0)
    k_param, k_x1, k_x2 = jax.random.split(key, 3)

    n_observations = 16   # e.g. flattened maze-state observation
    n_actions = 8
    params = init_dqn_params(k_param, n_observations, n_actions)

    # Small single-tile case (acting-style batch).
    x_small = jax.random.normal(k_x1, (8, n_observations), dtype=jnp.float32)
    out_small = jax.block_until_ready(dqn_forward(x_small, params))
    ref_small = dqn_reference(x_small, params)
    assert out_small.shape == (8, n_actions)
    assert out_small.dtype == jnp.float32
    assert jnp.allclose(out_small, ref_small, atol=2e-2, rtol=2e-2), \
        "small-batch mismatch vs reference"

    # Larger ragged batch: exercises the 2-step parallel grid + masked last block.
    x_big = jax.random.normal(k_x2, (1000, n_observations), dtype=jnp.float32)
    out_big = jax.block_until_ready(dqn_forward(x_big, params))
    ref_big = dqn_reference(x_big, params)
    assert out_big.shape == (1000, n_actions)
    assert jnp.allclose(out_big, ref_big, atol=2e-2, rtol=2e-2), \
        "large-batch mismatch vs reference"

    print("KERNEL_OK")
</pallas_src>

<mosaic_0001>
module attributes {stable_mosaic.version = 11 : i64} {
  func.func @dqn_kernel(%arg0: i32, %arg1: memref<8x16xf32, #tpu.memory_space<vmem>>, %arg2: memref<16x128xbf16, #tpu.memory_space<vmem>>, %arg3: memref<1x128xf32, #tpu.memory_space<vmem>>, %arg4: memref<128x128xbf16, #tpu.memory_space<vmem>>, %arg5: memref<1x128xf32, #tpu.memory_space<vmem>>, %arg6: memref<128x8xbf16, #tpu.memory_space<vmem>>, %arg7: memref<1x8xf32, #tpu.memory_space<vmem>>, %arg8: memref<8x8xf32, #tpu.memory_space<vmem>>) attributes {dimension_semantics = [#tpu.dimension_semantics<parallel>], iteration_bounds = array<i64: 1>, scalar_prefetch = 0 : i64, scratch_operands = 0 : i64, tpu.core_type = #tpu.core_type<tc>, window_params = [{transform_indices = @transform_0, window_bounds = array<i64: 8, 16>}, {pipeline_mode = #tpu.pipeline_mode<synchronous>, transform_indices = @transform_1, window_bounds = array<i64: 16, 128>}, {pipeline_mode = #tpu.pipeline_mode<synchronous>, transform_indices = @transform_2, window_bounds = array<i64: 1, 128>}, {pipeline_mode = #tpu.pipeline_mode<synchronous>, transform_indices = @transform_3, window_bounds = array<i64: 128, 128>}, {pipeline_mode = #tpu.pipeline_mode<synchronous>, transform_indices = @transform_4, window_bounds = array<i64: 1, 128>}, {pipeline_mode = #tpu.pipeline_mode<synchronous>, transform_indices = @transform_5, window_bounds = array<i64: 128, 8>}, {pipeline_mode = #tpu.pipeline_mode<synchronous>, transform_indices = @transform_6, window_bounds = array<i64: 1, 8>}, {transform_indices = @transform_7, window_bounds = array<i64: 8, 8>}]} {
    %c0 = arith.constant 0 : index
    %c0_0 = arith.constant 0 : index
    %0 = vector.load %arg1[%c0, %c0_0] : memref<8x16xf32, #tpu.memory_space<vmem>>, vector<8x16xf32>
    %1 = arith.truncf %0 : vector<8x16xf32> to vector<8x16xbf16>
    %c0_1 = arith.constant 0 : index
    %c0_2 = arith.constant 0 : index
    %2 = vector.load %arg2[%c0_1, %c0_2] : memref<16x128xbf16, #tpu.memory_space<vmem>>, vector<16x128xbf16>
    %cst = arith.constant dense<0.000000e+00> : vector<8x128xf32>
    %3 = tpu.matmul %1, %2, %cst {dimension_numbers = #tpu.dot_dimension_numbers<[1], [0], [0], [1], [0, 0, 1, 1], [], []>} : vector<8x16xbf16>, vector<16x128xbf16>, vector<8x128xf32> -> vector<8x128xf32>
    %c0_3 = arith.constant 0 : index
    %c0_4 = arith.constant 0 : index
    %4 = vector.load %arg3[%c0_3, %c0_4] : memref<1x128xf32, #tpu.memory_space<vmem>>, vector<1x128xf32>
    %5 = vector.broadcast %4 : vector<1x128xf32> to vector<8x128xf32>
    %6 = arith.addf %3, %5 : vector<8x128xf32>
    %cst_5 = arith.constant 0.000000e+00 : f32
    %7 = vector.broadcast %cst_5 : f32 to vector<8x128xf32>
    %8 = arith.maximumf %6, %7 : vector<8x128xf32>
    %9 = arith.truncf %8 : vector<8x128xf32> to vector<8x128xbf16>
    %c0_6 = arith.constant 0 : index
    %c0_7 = arith.constant 0 : index
    %10 = vector.load %arg4[%c0_6, %c0_7] : memref<128x128xbf16, #tpu.memory_space<vmem>>, vector<128x128xbf16>
    %cst_8 = arith.constant dense<0.000000e+00> : vector<8x128xf32>
    %11 = tpu.matmul %9, %10, %cst_8 {dimension_numbers = #tpu.dot_dimension_numbers<[1], [0], [0], [1], [0, 0, 1, 1], [], []>} : vector<8x128xbf16>, vector<128x128xbf16>, vector<8x128xf32> -> vector<8x128xf32>
    %c0_9 = arith.constant 0 : index
    %c0_10 = arith.constant 0 : index
    %12 = vector.load %arg5[%c0_9, %c0_10] : memref<1x128xf32, #tpu.memory_space<vmem>>, vector<1x128xf32>
    %13 = vector.broadcast %12 : vector<1x128xf32> to vector<8x128xf32>
    %14 = arith.addf %11, %13 : vector<8x128xf32>
    %cst_11 = arith.constant 0.000000e+00 : f32
    %15 = vector.broadcast %cst_11 : f32 to vector<8x128xf32>
    %16 = arith.maximumf %14, %15 : vector<8x128xf32>
    %17 = arith.truncf %16 : vector<8x128xf32> to vector<8x128xbf16>
    %c0_12 = arith.constant 0 : index
    %c0_13 = arith.constant 0 : index
    %18 = vector.load %arg6[%c0_12, %c0_13] : memref<128x8xbf16, #tpu.memory_space<vmem>>, vector<128x8xbf16>
    %cst_14 = arith.constant dense<0.000000e+00> : vector<8x8xf32>
    %19 = tpu.matmul %17, %18, %cst_14 {dimension_numbers = #tpu.dot_dimension_numbers<[1], [0], [0], [1], [0, 0, 1, 1], [], []>} : vector<8x128xbf16>, vector<128x8xbf16>, vector<8x8xf32> -> vector<8x8xf32>
    %c0_15 = arith.constant 0 : index
    %c0_16 = arith.constant 0 : index
    %20 = vector.load %arg7[%c0_15, %c0_16] : memref<1x8xf32, #tpu.memory_space<vmem>>, vector<1x8xf32>
    %21 = vector.broadcast %20 : vector<1x8xf32> to vector<8x8xf32>
    %22 = arith.addf %19, %21 : vector<8x8xf32>
    %c0_17 = arith.constant 0 : index
    %c0_18 = arith.constant 0 : index
    %23 = vector.load %arg8[%c0_17, %c0_18] : memref<8x8xf32, #tpu.memory_space<vmem>>, vector<8x8xf32>
    tpu.vector_store %arg8[%c0_17, %c0_18], %22 {strides = array<i32>} : memref<8x8xf32, #tpu.memory_space<vmem>>, vector<8x8xf32>,
    return
  }
  func.func @transform_0(%arg0: i32) -> (i32, i32) {
    %c0_i32 = arith.constant 0 : i32
    %c0_i32_0 = arith.constant 0 : i32
    return %arg0, %c0_i32 : i32, i32
  }
  func.func @transform_1(%arg0: i32) -> (i32, i32) {
    %c0_i32 = arith.constant 0 : i32
    %c0_i32_0 = arith.constant 0 : i32
    %c0_i32_1 = arith.constant 0 : i32
    return %c0_i32, %c0_i32_0 : i32, i32
  }
  func.func @transform_2(%arg0: i32) -> (i32, i32) {
    %c0_i32 = arith.constant 0 : i32
    %c0_i32_0 = arith.constant 0 : i32
    %c0_i32_1 = arith.constant 0 : i32
    return %c0_i32, %c0_i32_0 : i32, i32
  }
  func.func @transform_3(%arg0: i32) -> (i32, i32) {
    %c0_i32 = arith.constant 0 : i32
    %c0_i32_0 = arith.constant 0 : i32
    %c0_i32_1 = arith.constant 0 : i32
    return %c0_i32, %c0_i32_0 : i32, i32
  }
  func.func @transform_4(%arg0: i32) -> (i32, i32) {
    %c0_i32 = arith.constant 0 : i32
    %c0_i32_0 = arith.constant 0 : i32
    %c0_i32_1 = arith.constant 0 : i32
    return %c0_i32, %c0_i32_0 : i32, i32
  }
  func.func @transform_5(%arg0: i32) -> (i32, i32) {
    %c0_i32 = arith.constant 0 : i32
    %c0_i32_0 = arith.constant 0 : i32
    %c0_i32_1 = arith.constant 0 : i32
    return %c0_i32, %c0_i32_0 : i32, i32
  }
  func.func @transform_6(%arg0: i32) -> (i32, i32) {
    %c0_i32 = arith.constant 0 : i32
    %c0_i32_0 = arith.constant 0 : i32
    %c0_i32_1 = arith.constant 0 : i32
    return %c0_i32, %c0_i32_0 : i32, i32
  }
  func.func @transform_7(%arg0: i32) -> (i32, i32) {
    %c0_i32 = arith.constant 0 : i32
    %c0_i32_0 = arith.constant 0 : i32
    return %arg0, %c0_i32 : i32, i32
  }
}

</mosaic_0001>

<bundles_post_ra>
// kernel: tpu_custom_call.1
= control target key start
LH: loop header
LB: loop body
LE: loop exit
PB: predicated region body
PF: predicated region fallthrough
CT: control target
= control target key end

     0   :  { %12 = vsyncpa [#allocation3], 0  ;;  %s654_s0 = inlined_call_operand.vmem [shape: f32[8,16], index: 0, kind: input, shape index: {}]   ;;  %s655_s1 = inlined_call_operand.hbm [shape: bf16[16,128], index: 1, kind: input, shape index: {}]   ;;  %s656_s2 = inlined_call_operand.vmem [shape: f32[1,128], index: 2, kind: input, shape index: {}]   ;;  %s657_s3 = inlined_call_operand.vmem [shape: bf16[128,128], index: 3, kind: input, shape index: {}]   ;;  %s658_s4 = inlined_call_operand.vmem [shape: f32[1,128], index: 4, kind: input, shape index: {}]   ;;  %s659_s5 = inlined_call_operand.vmem [shape: bf16[128,8], index: 5, kind: input, shape index: {}]   ;;  %s660_s6 = inlined_call_operand.vmem [shape: f32[1,8], index: 6, kind: input, shape index: {}]   ;;  %s661_s7 = inlined_call_operand.hbm [shape: f32[8,8], index: 7, kind: output, shape index: {}]  }
   0x1   :  { %13 = vsyncpa [#allocation4], 0  ;;  %s504_s24 = smov [#allocation2]   ;;  %s456_s28 = scalar_lea.hbm %s655_s1, 128 }
   0x2   :  { %s21_s25 = sshll.u32 %s504_s24, 4  ;;  %p457_p0 = scmp.ne.s32.totalorder %s655_s1, %s456_s28  ;;  %s22_s25 = int_to_ptr.vmem [resolvable:$true] %s21_s25 }
   0x3   :  { %p460_p1 = scmp.lt.u32.totalorder %s456_s28, %s655_s1 }
   0x5   :  { %p462_p2 = pnand %p460_p1, %p457_p0 }
   0x7   :  { %465 = shalt.err (!%p462_p2)
}
   0x8   :  { %s466_s10 = scalar_lea.vmem %s22_s25, 128  ;;  %p471_p4 = scmp.lt.s32.totalorder %s22_s25, %s22_s25 }
   0x9   :  { %p467_p3 = scmp.ne.s32.totalorder %s22_s25, %s466_s10  ;;  %p472_p5 = scmp.lt.s32.totalorder %s466_s10, %s466_s10 }
   0xb   :  { %p473_p6 = por %p472_p5, %p471_p4 }
   0xd   :  { %p474_p7 = pnand %p473_p6, %p467_p3 }
   0xf   :  { %477 = shalt.err (!%p474_p7)
}
  0x10   :  { %s505_s11 = smov 64   ;;  %s506_s12 = smov 4  }
  0x11   :  { %27 = dma.hbm_to_vmem [thread:$0]  %s655_s1, 128, %s22_s25, [#allocation3], %s505_s11, %s505_s11, %s506_s12  }
  0x12   :  { %500 = dma.done.wait [#allocation3], 128  }
  0x13   :  { %501 = vsyncadd [#allocation3], 4294967168  ;;  %v507_v0 = vmov 0.0   ;;  %vm508_vm0 = vmmov 0   ;;  %v439_v1 = vld [vmem:[#allocation2] sm:$0xff]   ;;  %vm59_vm1 = vcmask 130048  }
  0x14   :  { %387 = vmatprep.subr.bf16.mxu0 %v507_v0  ;;  %389 = vmatprep.mubr.msk.bf16.mxu0 %vm508_vm0, %v507_v0  ;;  %v42_v2 = vld [vmem:[%s654_s0] sm:$0xff]  ;;  %v441_v5 = vld [vmem:[%s657_s3 + $0x8] sm:$0xff]   ;;  %v442_v6 = vld [vmem:[%s657_s3 + $0x10] sm:$0xff]   ;;  %s509_s26 = smov [#allocation5]   ;;  %vm329_vm2 = vcmask 64512  }
  0x15   :  { %393 = vmatprep.subr.bf16.mxu1 %v507_v0  ;;  %409 = vmatprep.mubr.msk.bf16.mxu1 %vm508_vm0, %v507_v0  ;;  %v43_v3 = vpack.c.bf16 %v42_v2, %v42_v2  ;;  %v440_v4 = vld [vmem:[%s657_s3] sm:$0xff]   ;;  %v443_v7 = vld [vmem:[%s657_s3 + $0x18] sm:$0xff]   ;;  %v445_v9 = vld [vmem:[%s657_s3 + $0x28] sm:$0xff]   ;;  %s337_s27 = sshll.u32 %s509_s26, 4  ;;  %s338_s27 = int_to_ptr.vmem [resolvable:$true] %s337_s27 }
  0x16   :  { %388 = vmatpush3.bf16.msra.mxu0 %v439_v1  ;;  %394 = vmatpush3.bf16.msra.mxu1 %v440_v4  ;;  %v444_v8 = vld [vmem:[%s657_s3 + $0x20] sm:$0xff]   ;;  %v446_v10 = vld [vmem:[%s657_s3 + $0x30] sm:$0xff]   ;;  %v447_v11 = vld [vmem:[%s657_s3 + $0x38] sm:$0xff]   ;;  %p483_p9 = scmp.lt.s32.totalorder %s338_s27, %s338_s27 }
  0x17   :  { %413 = vmatprep.subr.bf16.mxu0 %v507_v0  ;;  %395 = vmatprep.subr.bf16.mxu1 %v507_v0  ;;  %v448_v12 = vld [vmem:[%s659_s5] sm:$0xff]   ;;  %v449_v13 = vld [vmem:[%s659_s5 + $0x8] sm:$0xff]   ;;  %v450_v14 = vld [vmem:[%s659_s5 + $0x10] sm:$0xff]  }
  0x18   :  { %v451_v15 = vld [vmem:[%s659_s5 + $0x18] sm:$0xff]   ;;  %v452_v16 = vld [vmem:[%s659_s5 + $0x20] sm:$0xff]   ;;  %v453_v17 = vld [vmem:[%s659_s5 + $0x28] sm:$0xff]  }
  0x19   :  { %390 = vmatmul.mubr.msk.bf16.vlgmr.msra.gmra.mrb[0].mxu0 %vm59_vm1, %v43_v3  ;;  %v346_v18 = vld [vmem:[%s656_s2] ss:$0 sm:$0xff]  ;;  %v454_v26 = vld [vmem:[%s659_s5 + $0x30] sm:$0xff]   ;;  %v455_v27 = vld [vmem:[%s659_s5 + $0x38] sm:$0xff]  }
  0x1a   :  { %429 = vmatprep.mubr.msk.bf16.mxu0 %vm508_vm0, %v507_v0  ;;  %396 = vmatpush3.bf16.msra.mxu1 %v441_v5  ;;  %v349_v28 = vld [vmem:[%s658_s4] ss:$0 sm:$0xff]  ;;  %s478_s4 = scalar_lea.vmem %s338_s27, 128 }
  0x1b   :  { %397 = vmatprep.subr.bf16.mxu1 %v507_v0  ;;  %414 = vmatpush3.bf16.msra.mxu0 %v448_v12  ;;  %v358_v36 = vld [vmem:[%s660_s6] ss:$0 sm:$0xff]  ;;  %p479_p8 = scmp.ne.s32.totalorder %s338_s27, %s478_s4  ;;  %p484_p10 = scmp.lt.s32.totalorder %s478_s4, %s478_s4 }
  0x1c   :  { %415 = vmatprep.subr.bf16.mxu0 %v507_v0 }
  0x1d   :  { %p485_p11 = por %p484_p10, %p483_p9 }
  0x1e   :  { %398 = vmatpush3.bf16.msra.mxu1 %v442_v6 }
  0x1f   :  { %399 = vmatprep.subr.bf16.mxu1 %v507_v0  ;;  %416 = vmatpush3.bf16.msra.mxu0 %v449_v13  ;;  %p486_p12 = pnand %p485_p11, %p479_p8 }
  0x20   :  { %417 = vmatprep.subr.bf16.mxu0 %v507_v0 }
  0x22   :  { %400 = vmatpush3.bf16.msra.mxu1 %v443_v7 }
  0x23   :  { %401 = vmatprep.subr.bf16.mxu1 %v507_v0  ;;  %418 = vmatpush3.bf16.msra.mxu0 %v450_v14 }
  0x24   :  { %419 = vmatprep.subr.bf16.mxu0 %v507_v0 }
  0x26   :  { %402 = vmatpush3.bf16.msra.mxu1 %v444_v8 }
  0x27   :  { %403 = vmatprep.subr.bf16.mxu1 %v507_v0  ;;  %420 = vmatpush3.bf16.msra.mxu0 %v451_v15 }
  0x28   :  { %421 = vmatprep.subr.bf16.mxu0 %v507_v0 }
  0x2a   :  { %404 = vmatpush3.bf16.msra.mxu1 %v445_v9 }
  0x2b   :  { %405 = vmatprep.subr.bf16.mxu1 %v507_v0  ;;  %422 = vmatpush3.bf16.msra.mxu0 %v452_v16 }
  0x2c   :  { %423 = vmatprep.subr.bf16.mxu0 %v507_v0 }
  0x2e   :  { %406 = vmatpush3.bf16.msra.mxu1 %v446_v10 }
  0x2f   :  { %407 = vmatprep.subr.bf16.mxu1 %v507_v0  ;;  %424 = vmatpush3.bf16.msra.mxu0 %v453_v17 }
  0x30   :  { %425 = vmatprep.subr.bf16.mxu0 %v507_v0 }
  0x32   :  { %408 = vmatpush3.bf16.msra.mxu1 %v447_v11 }
  0x33   :  { %426 = vmatpush3.bf16.msra.mxu0 %v454_v26 }
  0x34   :  { %427 = vmatprep.subr.bf16.mxu0 %v507_v0 }
  0x37   :  { %428 = vmatpush3.bf16.msra.mxu0 %v455_v27 }
  0xec   :  { %v97_v19 = vpop.f32.mrb[0].mxu0 }
  0xed   :  { %v98_v20 = vadd.f32 %v346_v18, %v97_v19  ;;  %v391_v21 = vpop.f32.mrb[1].mxu0 }
  0xee   :  { %v100_v22 = vpop.f32.mrb[2].mxu0 }
  0xef   :  { %v103_v23 = vmax.f32 %v98_v20, 0.0  ;;  %v392_v24 = vpop.f32.mrb[3].mxu0 }
  0xf1   :  { %v104_v25 = vpack.c.bf16 %v103_v23, %v103_v23 }
  0xf3   :  { %410 = vmatmul.mubr.bf16.vlgmr.msra.gmra.mrb[0].mxu1 %v104_v25 }
 0x1c6   :  { %v210_v29 = vpop.f32.mrb[0].mxu1 }
 0x1c7   :  { %v211_v30 = vadd.f32 %v349_v28, %v210_v29  ;;  %v411_v31 = vpop.f32.mrb[1].mxu1 }
 0x1c8   :  { %v213_v32 = vpop.f32.mrb[2].mxu1 }
 0x1c9   :  { %v216_v33 = vmax.f32 %v211_v30, 0.0  ;;  %v412_v34 = vpop.f32.mrb[3].mxu1 }
 0x1cb   :  { %v217_v35 = vpack.c.bf16 %v216_v33, %v216_v33 }
 0x1cd   :  { %430 = vmatmul.mubr.bf16.vlgmr.msra.gmra.mrb[4].mxu0 %v217_v35 }
 0x2a0   :  { %v323_v37 = vpop.f32.mrb[4].mxu0 }
 0x2a1   :  { %v324_v38 = vadd.f32 %v358_v36, %v323_v37  ;;  %v431_v39 = vpop.f32.mrb[5].mxu0 }
 0x2a2   :  { %v326_v40 = vpop.f32.mrb[6].mxu0 }
 0x2a3   :  { %v432_v41 = vpop.f32.mrb[7].mxu0  ;;  %330 = vst.msk [vmem:[#allocation5] sm:$0xff] %vm329_vm2, %v324_v38 }
 0x2a4   :  { %489 = shalt.err (!%p486_p12)
}
 0x2a5   :  { %s490_s6 = scalar_lea.hbm %s661_s7, 128 }
 0x2a6   :  { %p491_p13 = scmp.ne.s32.totalorder %s661_s7, %s490_s6  ;;  %p494_p0 = scmp.lt.u32.totalorder %s490_s6, %s661_s7 }
 0x2a8   :  { %p496_p1 = pnand %p494_p0, %p491_p13 }
 0x2aa   :  { %499 = shalt.err (!%p496_p1)
}
 0x2ab   :  { %340 = dma.vmem_to_hbm [thread:$0]  %s338_s27, 128, %s661_s7, [#allocation4]  }
 0x2ac   :  { %502 = dma.done.wait [#allocation4], 128  }
 0x2ad   :  { %503 = vsyncadd [#allocation4], 4294967168 }
 0x2ae   :  { %344 = vsyncpa [#allocation3], 1 }
 0x2af   :  { %345 = vsyncpa [#allocation4], 1 }

</bundles_post_ra>
